<compile_context>
chip_gen: v6e
topology: v6e:2x2x1
jax: 0.10.0
libtpu: 0.0.40
codegen_flags: <defaults>
</compile_context>

<pallas_src>
import functools
import math

import jax
import jax.numpy as jnp
from jax.experimental import pallas as pl
from jax.experimental.pallas import tpu as pltpu

LEAKY_SLOPE = 0.2


def _leaky_relu(x, slope=LEAKY_SLOPE):
    return jnp.where(x > 0, x, slope * x)


def _round_up(x, m):
    return (x + m - 1) // m * m


def mapping_kernel(z_ref,
                   w1_ref, b1_ref,
                   w2_ref, b2_ref,
                   w3_ref, b3_ref,
                   w4_ref, b4_ref,
                   out_ref):
    # Layer 1
    h = jnp.dot(z_ref[...], w1_ref[...],
                preferred_element_type=jnp.float32) + b1_ref[...]
    h = _leaky_relu(h)
    # Layer 2
    h = jnp.dot(h.astype(jnp.bfloat16), w2_ref[...],
                preferred_element_type=jnp.float32) + b2_ref[...]
    h = _leaky_relu(h)
    # Layer 3
    h = jnp.dot(h.astype(jnp.bfloat16), w3_ref[...],
                preferred_element_type=jnp.float32) + b3_ref[...]
    h = _leaky_relu(h)
    # Layer 4 (no activation)
    out = jnp.dot(h.astype(jnp.bfloat16), w4_ref[...],
                  preferred_element_type=jnp.float32) + b4_ref[...]
    out_ref[...] = out.astype(out_ref.dtype)


@functools.partial(jax.jit, static_argnames=("tile_m",))
def mapping_network(z, params, *, tile_m=256):
    """StyleGAN mapping-MLP forward.

    z: (batch, z_dim) float array.
    params: list of 4 (W, b), W shaped (in, out), b shaped (1, out) or (out,).
    Returns (batch, out_dim) float32.
    """
    (w1, b1), (w2, b2), (w3, b3), (w4, b4) = params
    batch, z_dim = z.shape
    hidden = w1.shape[1]
    out_dim = w4.shape[1]

    # Lane-dense padding of feature dims to multiples of 128.
    z_p = _round_up(z_dim, 128)
    h_p = _round_up(hidden, 128)
    o_p = _round_up(out_dim, 128)

    # Batch tile: multiple of 16 sublanes (bf16 activations), capped at tile_m.
    tm = min(tile_m, _round_up(batch, 16))
    b_p = _round_up(batch, tm)
    grid_m = b_p // tm

    def pad_w(w, rows, cols):
        return jnp.pad(
            w, ((0, rows - w.shape[0]), (0, cols - w.shape[1]))
        ).astype(jnp.bfloat16)

    def pad_b(b, cols):
        b2d = jnp.reshape(b, (1, -1))
        return jnp.pad(b2d, ((0, 0), (0, cols - b2d.shape[1]))).astype(jnp.float32)

    zp = jnp.pad(z, ((0, b_p - batch), (0, z_p - z_dim))).astype(jnp.bfloat16)
    w1p, b1p = pad_w(w1, z_p, h_p), pad_b(b1, h_p)
    w2p, b2p = pad_w(w2, h_p, h_p), pad_b(b2, h_p)
    w3p, b3p = pad_w(w3, h_p, h_p), pad_b(b3, h_p)
    w4p, b4p = pad_w(w4, h_p, o_p), pad_b(b4, o_p)

    const = lambda i: (0, 0)          # weights/biases stay VMEM-resident
    batch_map = lambda i: (i, 0)      # stream batch tiles

    weight_specs = [
        pl.BlockSpec((z_p, h_p), const), pl.BlockSpec((1, h_p), const),
        pl.BlockSpec((h_p, h_p), const), pl.BlockSpec((1, h_p), const),
        pl.BlockSpec((h_p, h_p), const), pl.BlockSpec((1, h_p), const),
        pl.BlockSpec((h_p, o_p), const), pl.BlockSpec((1, o_p), const),
    ]

    flops = 2 * b_p * (z_p * h_p + 2 * h_p * h_p + h_p * o_p)
    weight_bytes = (2 * (z_p * h_p + 2 * h_p * h_p + h_p * o_p)
                    + 4 * (3 * h_p + o_p))
    bytes_accessed = b_p * z_p * 2 + b_p * o_p * 4 + weight_bytes

    out_padded = pl.pallas_call(
        mapping_kernel,
        out_shape=jax.ShapeDtypeStruct((b_p, o_p), jnp.float32),
        grid=(grid_m,),
        in_specs=[pl.BlockSpec((tm, z_p), batch_map)] + weight_specs,
        out_specs=pl.BlockSpec((tm, o_p), batch_map),
        compiler_params=pltpu.CompilerParams(
            dimension_semantics=("parallel",)),
        cost_estimate=pl.CostEstimate(flops=flops,
                                      transcendentals=0,
                                      bytes_accessed=bytes_accessed),
    )(zp, w1p, b1p, w2p, b2p, w3p, b3p, w4p, b4p)

    return out_padded[:batch, :out_dim]


def init_params(key, z_dim, hidden, out_dim):
    """kaiming_normal_(a=0.2, fan_in, leaky_relu) weights; PyTorch-default
    uniform(-1/sqrt(fan_in), 1/sqrt(fan_in)) biases. W stored as (in, out)."""
    dims = [(z_dim, hidden), (hidden, hidden), (hidden, hidden), (hidden, out_dim)]
    params = []
    gain = math.sqrt(2.0 / (1.0 + 0.2 ** 2))
    for i, (fan_in, fan_out) in enumerate(dims):
        kw, kb = jax.random.split(jax.random.fold_in(key, i))
        std = gain / math.sqrt(fan_in)
        w = std * jax.random.normal(kw, (fan_in, fan_out), dtype=jnp.float32)
        bound = 1.0 / math.sqrt(fan_in)
        b = jax.random.uniform(kb, (1, fan_out), minval=-bound, maxval=bound,
                               dtype=jnp.float32)
        params.append((w, b))
    return params


def reference_forward(z, params):
    """Pure-JAX reference mimicking the kernel's precision: bf16 matmul
    operands, f32 accumulation, bias-add + LeakyReLU in f32."""
    h = z.astype(jnp.bfloat16)
    for i, (w, b) in enumerate(params):
        h = jnp.dot(h, w.astype(jnp.bfloat16),
                    preferred_element_type=jnp.float32) + b.astype(jnp.float32)
        if i < len(params) - 1:
            h = jnp.where(h > 0, h, LEAKY_SLOPE * h)
            h = h.astype(jnp.bfloat16)
    return h


if __name__ == "__main__":
    key = jax.random.PRNGKey(0)
    batch, z_dim, hidden, out_dim = 8, 32, 64, 96

    k_z, k_p = jax.random.split(key)
    z = jax.random.normal(k_z, (batch, z_dim), dtype=jnp.float32)
    params = init_params(k_p, z_dim, hidden, out_dim)

    out = mapping_network(z, params)
    out = jax.block_until_ready(out)

    ref = reference_forward(z, params)
    assert out.shape == (batch, out_dim)
    assert jnp.allclose(out, ref, atol=1e-3, rtol=1e-3), "mismatch vs reference"

    # Loose sanity check against a pure-f32 forward (bf16 rounding only).
    ref_f32 = z
    for i, (w, b) in enumerate(params):
        ref_f32 = ref_f32 @ w + b
        if i < len(params) - 1:
            ref_f32 = jnp.where(ref_f32 > 0, ref_f32, LEAKY_SLOPE * ref_f32)
    assert jnp.allclose(out, ref_f32, atol=5e-2, rtol=5e-2), "bf16 drift too large"

    print("KERNEL_OK")
</pallas_src>

<mosaic_0001>
module attributes {stable_mosaic.version = 11 : i64} {
  func.func @mapping_kernel(%arg0: i32, %arg1: memref<16x128xbf16, #tpu.memory_space<vmem>>, %arg2: memref<128x128xbf16, #tpu.memory_space<vmem>>, %arg3: memref<1x128xf32, #tpu.memory_space<vmem>>, %arg4: memref<128x128xbf16, #tpu.memory_space<vmem>>, %arg5: memref<1x128xf32, #tpu.memory_space<vmem>>, %arg6: memref<128x128xbf16, #tpu.memory_space<vmem>>, %arg7: memref<1x128xf32, #tpu.memory_space<vmem>>, %arg8: memref<128x128xbf16, #tpu.memory_space<vmem>>, %arg9: memref<1x128xf32, #tpu.memory_space<vmem>>, %arg10: memref<16x128xf32, #tpu.memory_space<vmem>>) attributes {dimension_semantics = [#tpu.dimension_semantics<parallel>], iteration_bounds = array<i64: 1>, scalar_prefetch = 0 : i64, scratch_operands = 0 : i64, tpu.core_type = #tpu.core_type<tc>, window_params = [{transform_indices = @transform_0, window_bounds = array<i64: 16, 128>}, {pipeline_mode = #tpu.pipeline_mode<synchronous>, transform_indices = @transform_1, window_bounds = array<i64: 128, 128>}, {pipeline_mode = #tpu.pipeline_mode<synchronous>, transform_indices = @transform_2, window_bounds = array<i64: 1, 128>}, {pipeline_mode = #tpu.pipeline_mode<synchronous>, transform_indices = @transform_3, window_bounds = array<i64: 128, 128>}, {pipeline_mode = #tpu.pipeline_mode<synchronous>, transform_indices = @transform_4, window_bounds = array<i64: 1, 128>}, {pipeline_mode = #tpu.pipeline_mode<synchronous>, transform_indices = @transform_5, window_bounds = array<i64: 128, 128>}, {pipeline_mode = #tpu.pipeline_mode<synchronous>, transform_indices = @transform_6, window_bounds = array<i64: 1, 128>}, {pipeline_mode = #tpu.pipeline_mode<synchronous>, transform_indices = @transform_7, window_bounds = array<i64: 128, 128>}, {pipeline_mode = #tpu.pipeline_mode<synchronous>, transform_indices = @transform_8, window_bounds = array<i64: 1, 128>}, {transform_indices = @transform_9, window_bounds = array<i64: 16, 128>}]} {
    %c0 = arith.constant 0 : index
    %c0_0 = arith.constant 0 : index
    %0 = vector.load %arg1[%c0, %c0_0] : memref<16x128xbf16, #tpu.memory_space<vmem>>, vector<16x128xbf16>
    %c0_1 = arith.constant 0 : index
    %c0_2 = arith.constant 0 : index
    %1 = vector.load %arg2[%c0_1, %c0_2] : memref<128x128xbf16, #tpu.memory_space<vmem>>, vector<128x128xbf16>
    %cst = arith.constant dense<0.000000e+00> : vector<16x128xf32>
    %2 = tpu.matmul %0, %1, %cst {dimension_numbers = #tpu.dot_dimension_numbers<[1], [0], [0], [1], [0, 0, 1, 1], [], []>} : vector<16x128xbf16>, vector<128x128xbf16>, vector<16x128xf32> -> vector<16x128xf32>
    %c0_3 = arith.constant 0 : index
    %c0_4 = arith.constant 0 : index
    %3 = vector.load %arg3[%c0_3, %c0_4] : memref<1x128xf32, #tpu.memory_space<vmem>>, vector<1x128xf32>
    %4 = vector.broadcast %3 : vector<1x128xf32> to vector<16x128xf32>
    %5 = arith.addf %2, %4 : vector<16x128xf32>
    %cst_5 = arith.constant 0.000000e+00 : f32
    %6 = vector.broadcast %cst_5 : f32 to vector<16x128xf32>
    %7 = arith.cmpf ogt, %5, %6 : vector<16x128xf32>
    %cst_6 = arith.constant 2.000000e-01 : f32
    %8 = vector.broadcast %cst_6 : f32 to vector<16x128xf32>
    %9 = arith.mulf %8, %5 : vector<16x128xf32>
    %10 = arith.select %7, %5, %9 : vector<16x128xi1>, vector<16x128xf32>
    %11 = arith.truncf %10 : vector<16x128xf32> to vector<16x128xbf16>
    %c0_7 = arith.constant 0 : index
    %c0_8 = arith.constant 0 : index
    %12 = vector.load %arg4[%c0_7, %c0_8] : memref<128x128xbf16, #tpu.memory_space<vmem>>, vector<128x128xbf16>
    %cst_9 = arith.constant dense<0.000000e+00> : vector<16x128xf32>
    %13 = tpu.matmul %11, %12, %cst_9 {dimension_numbers = #tpu.dot_dimension_numbers<[1], [0], [0], [1], [0, 0, 1, 1], [], []>} : vector<16x128xbf16>, vector<128x128xbf16>, vector<16x128xf32> -> vector<16x128xf32>
    %c0_10 = arith.constant 0 : index
    %c0_11 = arith.constant 0 : index
    %14 = vector.load %arg5[%c0_10, %c0_11] : memref<1x128xf32, #tpu.memory_space<vmem>>, vector<1x128xf32>
    %15 = vector.broadcast %14 : vector<1x128xf32> to vector<16x128xf32>
    %16 = arith.addf %13, %15 : vector<16x128xf32>
    %cst_12 = arith.constant 0.000000e+00 : f32
    %17 = vector.broadcast %cst_12 : f32 to vector<16x128xf32>
    %18 = arith.cmpf ogt, %16, %17 : vector<16x128xf32>
    %cst_13 = arith.constant 2.000000e-01 : f32
    %19 = vector.broadcast %cst_13 : f32 to vector<16x128xf32>
    %20 = arith.mulf %19, %16 : vector<16x128xf32>
    %21 = arith.select %18, %16, %20 : vector<16x128xi1>, vector<16x128xf32>
    %22 = arith.truncf %21 : vector<16x128xf32> to vector<16x128xbf16>
    %c0_14 = arith.constant 0 : index
    %c0_15 = arith.constant 0 : index
    %23 = vector.load %arg6[%c0_14, %c0_15] : memref<128x128xbf16, #tpu.memory_space<vmem>>, vector<128x128xbf16>
    %cst_16 = arith.constant dense<0.000000e+00> : vector<16x128xf32>
    %24 = tpu.matmul %22, %23, %cst_16 {dimension_numbers = #tpu.dot_dimension_numbers<[1], [0], [0], [1], [0, 0, 1, 1], [], []>} : vector<16x128xbf16>, vector<128x128xbf16>, vector<16x128xf32> -> vector<16x128xf32>
    %c0_17 = arith.constant 0 : index
    %c0_18 = arith.constant 0 : index
    %25 = vector.load %arg7[%c0_17, %c0_18] : memref<1x128xf32, #tpu.memory_space<vmem>>, vector<1x128xf32>
    %26 = vector.broadcast %25 : vector<1x128xf32> to vector<16x128xf32>
    %27 = arith.addf %24, %26 : vector<16x128xf32>
    %cst_19 = arith.constant 0.000000e+00 : f32
    %28 = vector.broadcast %cst_19 : f32 to vector<16x128xf32>
    %29 = arith.cmpf ogt, %27, %28 : vector<16x128xf32>
    %cst_20 = arith.constant 2.000000e-01 : f32
    %30 = vector.broadcast %cst_20 : f32 to vector<16x128xf32>
    %31 = arith.mulf %30, %27 : vector<16x128xf32>
    %32 = arith.select %29, %27, %31 : vector<16x128xi1>, vector<16x128xf32>
    %33 = arith.truncf %32 : vector<16x128xf32> to vector<16x128xbf16>
    %c0_21 = arith.constant 0 : index
    %c0_22 = arith.constant 0 : index
    %34 = vector.load %arg8[%c0_21, %c0_22] : memref<128x128xbf16, #tpu.memory_space<vmem>>, vector<128x128xbf16>
    %cst_23 = arith.constant dense<0.000000e+00> : vector<16x128xf32>
    %35 = tpu.matmul %33, %34, %cst_23 {dimension_numbers = #tpu.dot_dimension_numbers<[1], [0], [0], [1], [0, 0, 1, 1], [], []>} : vector<16x128xbf16>, vector<128x128xbf16>, vector<16x128xf32> -> vector<16x128xf32>
    %c0_24 = arith.constant 0 : index
    %c0_25 = arith.constant 0 : index
    %36 = vector.load %arg9[%c0_24, %c0_25] : memref<1x128xf32, #tpu.memory_space<vmem>>, vector<1x128xf32>
    %37 = vector.broadcast %36 : vector<1x128xf32> to vector<16x128xf32>
    %38 = arith.addf %35, %37 : vector<16x128xf32>
    %c0_26 = arith.constant 0 : index
    %c0_27 = arith.constant 0 : index
    %39 = vector.load %arg10[%c0_26, %c0_27] : memref<16x128xf32, #tpu.memory_space<vmem>>, vector<16x128xf32>
    tpu.vector_store %arg10[%c0_26, %c0_27], %38 {strides = array<i32>} : memref<16x128xf32, #tpu.memory_space<vmem>>, vector<16x128xf32>,
    return
  }
  func.func @transform_0(%arg0: i32) -> (i32, i32) {
    %c0_i32 = arith.constant 0 : i32
    %c0_i32_0 = arith.constant 0 : i32
    return %arg0, %c0_i32 : i32, i32
  }
  func.func @transform_1(%arg0: i32) -> (i32, i32) {
    %c0_i32 = arith.constant 0 : i32
    %c0_i32_0 = arith.constant 0 : i32
    %c0_i32_1 = arith.constant 0 : i32
    return %c0_i32, %c0_i32_0 : i32, i32
  }
  func.func @transform_2(%arg0: i32) -> (i32, i32) {
    %c0_i32 = arith.constant 0 : i32
    %c0_i32_0 = arith.constant 0 : i32
    %c0_i32_1 = arith.constant 0 : i32
    return %c0_i32, %c0_i32_0 : i32, i32
  }
  func.func @transform_3(%arg0: i32) -> (i32, i32) {
    %c0_i32 = arith.constant 0 : i32
    %c0_i32_0 = arith.constant 0 : i32
    %c0_i32_1 = arith.constant 0 : i32
    return %c0_i32, %c0_i32_0 : i32, i32
  }
  func.func @transform_4(%arg0: i32) -> (i32, i32) {
    %c0_i32 = arith.constant 0 : i32
    %c0_i32_0 = arith.constant 0 : i32
    %c0_i32_1 = arith.constant 0 : i32
    return %c0_i32, %c0_i32_0 : i32, i32
  }
  func.func @transform_5(%arg0: i32) -> (i32, i32) {
    %c0_i32 = arith.constant 0 : i32
    %c0_i32_0 = arith.constant 0 : i32
    %c0_i32_1 = arith.constant 0 : i32
    return %c0_i32, %c0_i32_0 : i32, i32
  }
  func.func @transform_6(%arg0: i32) -> (i32, i32) {
    %c0_i32 = arith.constant 0 : i32
    %c0_i32_0 = arith.constant 0 : i32
    %c0_i32_1 = arith.constant 0 : i32
    return %c0_i32, %c0_i32_0 : i32, i32
  }
  func.func @transform_7(%arg0: i32) -> (i32, i32) {
    %c0_i32 = arith.constant 0 : i32
    %c0_i32_0 = arith.constant 0 : i32
    %c0_i32_1 = arith.constant 0 : i32
    return %c0_i32, %c0_i32_0 : i32, i32
  }
  func.func @transform_8(%arg0: i32) -> (i32, i32) {
    %c0_i32 = arith.constant 0 : i32
    %c0_i32_0 = arith.constant 0 : i32
    %c0_i32_1 = arith.constant 0 : i32
    return %c0_i32, %c0_i32_0 : i32, i32
  }
  func.func @transform_9(%arg0: i32) -> (i32, i32) {
    %c0_i32 = arith.constant 0 : i32
    %c0_i32_0 = arith.constant 0 : i32
    return %arg0, %c0_i32 : i32, i32
  }
}

</mosaic_0001>

<bundles_post_ra>
// kernel: mapping_network.1
= control target key start
LH: loop header
LB: loop body
LE: loop exit
PB: predicated region body
PF: predicated region fallthrough
CT: control target
= control target key end

     0   :  { %v704_v0 = vmov 0.0   ;;  %vm705_vm0 = vmmov 0   ;;  %s913_s1 = inlined_call_operand.vmem [shape: bf16[128,128], index: 1, kind: input, shape index: {}]   ;;  %s914_s3 = inlined_call_operand.vmem [shape: bf16[128,128], index: 3, kind: input, shape index: {}]   ;;  %s915_s0 = inlined_call_operand.vmem [shape: bf16[16,128], index: 0, kind: input, shape index: {}]   ;;  %s916_s5 = inlined_call_operand.vmem [shape: bf16[128,128], index: 5, kind: input, shape index: {}]   ;;  %s917_s2 = inlined_call_operand.vmem [shape: f32[1,128], index: 2, kind: input, shape index: {}]   ;;  %s918_s7 = inlined_call_operand.vmem [shape: bf16[128,128], index: 7, kind: input, shape index: {}]   ;;  %s919_s4 = inlined_call_operand.vmem [shape: f32[1,128], index: 4, kind: input, shape index: {}]   ;;  %s920_s6 = inlined_call_operand.vmem [shape: f32[1,128], index: 6, kind: input, shape index: {}]   ;;  %s921_s8 = inlined_call_operand.vmem [shape: f32[1,128], index: 8, kind: input, shape index: {}]   ;;  %s922_s9 = inlined_call_operand.vmem [shape: f32[16,128], index: 9, kind: output, shape index: {}]  }
   0x1   :  { %589 = vmatprep.subr.bf16.mxu0 %v704_v0  ;;  %v671_v1 = vld [vmem:[%s913_s1 + $0x38] sm:$0xff]   ;;  %605 = vmatprep.mubr.msk.bf16.mxu0 %vm705_vm0, %v704_v0  ;;  %v672_v2 = vld [vmem:[%s913_s1 + $0x30] sm:$0xff]   ;;  %v673_v3 = vld [vmem:[%s913_s1 + $0x28] sm:$0xff]  }
   0x2   :  { %609 = vmatprep.subr.bf16.mxu1 %v704_v0  ;;  %625 = vmatprep.mubr.msk.bf16.mxu1 %vm705_vm0, %v704_v0  ;;  %v680_v4 = vld [vmem:[%s914_s3 + $0x38] sm:$0xff]   ;;  %v674_v5 = vld [vmem:[%s913_s1 + $0x20] sm:$0xff]   ;;  %v681_v6 = vld [vmem:[%s914_s3 + $0x30] sm:$0xff]  }
   0x3   :  { %590 = vmatpush3.bf16.msra.mxu0 %v671_v1  ;;  %610 = vmatpush3.bf16.msra.mxu1 %v680_v4  ;;  %v675_v7 = vld [vmem:[%s913_s1 + $0x18] sm:$0xff]   ;;  %v682_v8 = vld [vmem:[%s914_s3 + $0x28] sm:$0xff]   ;;  %v676_v9 = vld [vmem:[%s913_s1 + $0x10] sm:$0xff]  }
   0x4   :  { %591 = vmatprep.subr.bf16.mxu0 %v704_v0  ;;  %611 = vmatprep.subr.bf16.mxu1 %v704_v0  ;;  %v683_v10 = vld [vmem:[%s914_s3 + $0x20] sm:$0xff]   ;;  %v677_v11 = vld [vmem:[%s913_s1 + $0x8] sm:$0xff]   ;;  %v684_v12 = vld [vmem:[%s914_s3 + $0x18] sm:$0xff]  }
   0x5   :  { %v678_v13 = vld [vmem:[%s913_s1] sm:$0xff]   ;;  %v685_v15 = vld [vmem:[%s914_s3 + $0x10] sm:$0xff]   ;;  %v686_v16 = vld [vmem:[%s914_s3 + $0x8] sm:$0xff]  }
   0x6   :  { %v679_v14 = vld [vmem:[%s915_s0] sm:$0xff]   ;;  %v688_v18 = vld [vmem:[%s916_s5 + $0x38] sm:$0xff]   ;;  %v689_v19 = vld [vmem:[%s916_s5 + $0x30] sm:$0xff]  }
   0x7   :  { %592 = vmatpush3.bf16.msra.mxu0 %v672_v2  ;;  %612 = vmatpush3.bf16.msra.mxu1 %v681_v6  ;;  %v687_v17 = vld [vmem:[%s914_s3] sm:$0xff]   ;;  %v690_v20 = vld [vmem:[%s916_s5 + $0x28] sm:$0xff]   ;;  %v692_v22 = vld [vmem:[%s916_s5 + $0x18] sm:$0xff]  }
   0x8   :  { %593 = vmatprep.subr.bf16.mxu0 %v704_v0  ;;  %613 = vmatprep.subr.bf16.mxu1 %v704_v0  ;;  %v691_v21 = vld [vmem:[%s916_s5 + $0x20] sm:$0xff]   ;;  %v693_v35 = vld [vmem:[%s916_s5 + $0x10] sm:$0xff]   ;;  %v694_v36 = vld [vmem:[%s916_s5 + $0x8] sm:$0xff]  }
   0x9   :  { %v516_v23 = vld [vmem:[%s917_s2] ss:$0 sm:$0xff]  ;;  %v696_v38 = vld [vmem:[%s918_s7 + $0x38] sm:$0xff]   ;;  %v697_v39 = vld [vmem:[%s918_s7 + $0x30] sm:$0xff]  }
   0xa   :  { %v695_v37 = vld [vmem:[%s916_s5] sm:$0xff]   ;;  %v698_v40 = vld [vmem:[%s918_s7 + $0x28] sm:$0xff]   ;;  %v700_v42 = vld [vmem:[%s918_s7 + $0x18] sm:$0xff]  }
   0xb   :  { %594 = vmatpush3.bf16.msra.mxu0 %v673_v3  ;;  %614 = vmatpush3.bf16.msra.mxu1 %v682_v8  ;;  %v699_v41 = vld [vmem:[%s918_s7 + $0x20] sm:$0xff]   ;;  %v701_v55 = vld [vmem:[%s918_s7 + $0x10] sm:$0xff]   ;;  %v702_v56 = vld [vmem:[%s918_s7 + $0x8] sm:$0xff]  }
   0xc   :  { %595 = vmatprep.subr.bf16.mxu0 %v704_v0  ;;  %615 = vmatprep.subr.bf16.mxu1 %v704_v0  ;;  %v526_v43 = vld [vmem:[%s919_s4] ss:$0 sm:$0xff] }
   0xd   :  { %v703_v57 = vld [vmem:[%s918_s7] sm:$0xff]  }
   0xe   :  { %v535_v58 = vld [vmem:[%s920_s6] ss:$0 sm:$0xff] }
   0xf   :  { %596 = vmatpush3.bf16.msra.mxu0 %v674_v5  ;;  %616 = vmatpush3.bf16.msra.mxu1 %v683_v10  ;;  %v544_v6 = vld [vmem:[%s921_s8] ss:$0 sm:$0xff] }
  0x10   :  { %597 = vmatprep.subr.bf16.mxu0 %v704_v0  ;;  %617 = vmatprep.subr.bf16.mxu1 %v704_v0 }
  0x13   :  { %598 = vmatpush3.bf16.msra.mxu0 %v675_v7  ;;  %618 = vmatpush3.bf16.msra.mxu1 %v684_v12 }
  0x14   :  { %599 = vmatprep.subr.bf16.mxu0 %v704_v0  ;;  %619 = vmatprep.subr.bf16.mxu1 %v704_v0 }
  0x17   :  { %600 = vmatpush3.bf16.msra.mxu0 %v676_v9  ;;  %620 = vmatpush3.bf16.msra.mxu1 %v685_v15 }
  0x18   :  { %601 = vmatprep.subr.bf16.mxu0 %v704_v0  ;;  %621 = vmatprep.subr.bf16.mxu1 %v704_v0 }
  0x1b   :  { %602 = vmatpush3.bf16.msra.mxu0 %v677_v11  ;;  %622 = vmatpush3.bf16.msra.mxu1 %v686_v16 }
  0x1c   :  { %603 = vmatprep.subr.bf16.mxu0 %v704_v0  ;;  %623 = vmatprep.subr.bf16.mxu1 %v704_v0 }
  0x1f   :  { %604 = vmatpush3.bf16.msra.mxu0 %v678_v13  ;;  %624 = vmatpush3.bf16.msra.mxu1 %v687_v17 }
  0x20   :  { %629 = vmatprep.subr.bf16.mxu0 %v704_v0  ;;  %649 = vmatprep.subr.bf16.mxu1 %v704_v0 }
  0x22   :  { %606 = vmatmul.mubr.bf16.vlgmr.msra.gmra.mxu0 %v679_v14 }
  0x23   :  { %645 = vmatprep.mubr.msk.bf16.mxu0 %vm705_vm0, %v704_v0  ;;  %630 = vmatpush3.bf16.msra.mxu0 %v688_v18 }
  0x24   :  { %631 = vmatprep.subr.bf16.mxu0 %v704_v0 }
  0x27   :  { %632 = vmatpush3.bf16.msra.mxu0 %v689_v19 }
  0x28   :  { %633 = vmatprep.subr.bf16.mxu0 %v704_v0 }
  0x2b   :  { %634 = vmatpush3.bf16.msra.mxu0 %v690_v20 }
  0x2c   :  { %635 = vmatprep.subr.bf16.mxu0 %v704_v0 }
  0x2f   :  { %636 = vmatpush3.bf16.msra.mxu0 %v691_v21 }
  0x30   :  { %637 = vmatprep.subr.bf16.mxu0 %v704_v0 }
  0x33   :  { %638 = vmatpush3.bf16.msra.mxu0 %v692_v22 }
  0x34   :  { %639 = vmatprep.subr.bf16.mxu0 %v704_v0 }
  0x37   :  { %640 = vmatpush3.bf16.msra.mxu0 %v693_v35 }
  0x38   :  { %641 = vmatprep.subr.bf16.mxu0 %v704_v0 }
  0x3b   :  { %642 = vmatpush3.bf16.msra.mxu0 %v694_v36 }
  0x3c   :  { %643 = vmatprep.subr.bf16.mxu0 %v704_v0 }
  0x3f   :  { %644 = vmatpush3.bf16.msra.mxu0 %v695_v37 }
  0xe2   :  { %v146_v24 = vpop.f32.mrf.mxu0 }
  0xe3   :  { %v147_v25 = vadd.f32 %v516_v23, %v146_v24 }
  0xe4   :  { %v607_v26 = vpop.f32.mrf.mxu0 }
  0xe5   :  { %v155_v28 = vmul.f32 0.2, %v147_v25  ;;  %vm153_vm1 = vcmp.gt.f32.partialorder %v147_v25, 0.0 }
  0xe6   :  { %v149_v27 = vpop.f32.mrf.mxu0 }
  0xe7   :  { %v150_v29 = vadd.f32 %v516_v23, %v149_v27  ;;  %v157_v32 = vsel %vm153_vm1, %v147_v25, %v155_v28 }
  0xe8   :  { %v608_v30 = vpop.f32.mrf.mxu0 }
  0xe9   :  { %vm154_vm2 = vcmp.gt.f32.partialorder %v150_v29, 0.0  ;;  %v156_v31 = vmul.f32 0.2, %v150_v29 }
  0xeb   :  { %v158_v33 = vsel %vm154_vm2, %v150_v29, %v156_v31 }
  0xec   :  { %v159_v34 = vpack.c.bf16 %v158_v33, %v157_v32 }
  0xee   :  { %626 = vmatmul.mubr.bf16.vlgmr.msra.gmra.mxu1 %v159_v34 }
  0xef   :  { %665 = vmatprep.mubr.msk.bf16.mxu1 %vm705_vm0, %v704_v0  ;;  %650 = vmatpush3.bf16.msra.mxu1 %v696_v38 }
  0xf0   :  { %651 = vmatprep.subr.bf16.mxu1 %v704_v0 }
  0xf3   :  { %652 = vmatpush3.bf16.msra.mxu1 %v697_v39 }
  0xf4   :  { %653 = vmatprep.subr.bf16.mxu1 %v704_v0 }
  0xf7   :  { %654 = vmatpush3.bf16.msra.mxu1 %v698_v40 }
  0xf8   :  { %655 = vmatprep.subr.bf16.mxu1 %v704_v0 }
  0xfb   :  { %656 = vmatpush3.bf16.msra.mxu1 %v699_v41 }
  0xfc   :  { %657 = vmatprep.subr.bf16.mxu1 %v704_v0 }
  0xff   :  { %658 = vmatpush3.bf16.msra.mxu1 %v700_v42 }
 0x100   :  { %659 = vmatprep.subr.bf16.mxu1 %v704_v0 }
 0x103   :  { %660 = vmatpush3.bf16.msra.mxu1 %v701_v55 }
 0x104   :  { %661 = vmatprep.subr.bf16.mxu1 %v704_v0 }
 0x107   :  { %662 = vmatpush3.bf16.msra.mxu1 %v702_v56 }
 0x108   :  { %663 = vmatprep.subr.bf16.mxu1 %v704_v0 }
 0x10b   :  { %664 = vmatpush3.bf16.msra.mxu1 %v703_v57 }
 0x1ae   :  { %v265_v44 = vpop.f32.mrf.mxu1 }
 0x1af   :  { %v266_v45 = vadd.f32 %v526_v43, %v265_v44 }
 0x1b0   :  { %v627_v46 = vpop.f32.mrf.mxu1 }
 0x1b1   :  { %v274_v48 = vmul.f32 0.2, %v266_v45  ;;  %vm272_vm3 = vcmp.gt.f32.partialorder %v266_v45, 0.0 }
 0x1b2   :  { %v268_v47 = vpop.f32.mrf.mxu1 }
 0x1b3   :  { %v269_v49 = vadd.f32 %v526_v43, %v268_v47  ;;  %v276_v52 = vsel %vm272_vm3, %v266_v45, %v274_v48 }
 0x1b4   :  { %v628_v50 = vpop.f32.mrf.mxu1 }
 0x1b5   :  { %vm273_vm4 = vcmp.gt.f32.partialorder %v269_v49, 0.0  ;;  %v275_v51 = vmul.f32 0.2, %v269_v49 }
 0x1b7   :  { %v277_v53 = vsel %vm273_vm4, %v269_v49, %v275_v51 }
 0x1b8   :  { %v278_v54 = vpack.c.bf16 %v277_v53, %v276_v52 }
 0x1ba   :  { %646 = vmatmul.mubr.bf16.vlgmr.msra.gmra.mxu0 %v278_v54 }
 0x27a   :  { %v384_v59 = vpop.f32.mrf.mxu0 }
 0x27b   :  { %v385_v60 = vadd.f32 %v535_v58, %v384_v59 }
 0x27c   :  { %v647_v61 = vpop.f32.mrf.mxu0 }
 0x27d   :  { %v393_v63 = vmul.f32 0.2, %v385_v60  ;;  %vm391_vm5 = vcmp.gt.f32.partialorder %v385_v60, 0.0 }
 0x27e   :  { %v387_v62 = vpop.f32.mrf.mxu0 }
 0x27f   :  { %v388_v1 = vadd.f32 %v535_v58, %v387_v62  ;;  %v395_v0 = vsel %vm391_vm5, %v385_v60, %v393_v63 }
 0x280   :  { %v648_v2 = vpop.f32.mrf.mxu0 }
 0x281   :  { %vm392_vm6 = vcmp.gt.f32.partialorder %v388_v1, 0.0  ;;  %v394_v3 = vmul.f32 0.2, %v388_v1 }
 0x283   :  { %v396_v4 = vsel %vm392_vm6, %v388_v1, %v394_v3 }
 0x284   :  { %v397_v5 = vpack.c.bf16 %v396_v4, %v395_v0 }
 0x286   :  { %666 = vmatmul.mubr.bf16.vlgmr.msra.gmra.mxu1 %v397_v5 }
 0x346   :  { %v503_v7 = vpop.f32.mrf.mxu1 }
 0x347   :  { %v504_v8 = vadd.f32 %v544_v6, %v503_v7 }
 0x348   :  { %v667_v9 = vpop.f32.mrf.mxu1 }
 0x349   :  { %510 = vst [vmem:[%s922_s9] sm:$0xff] %v504_v8 }
 0x34a   :  { %v506_v10 = vpop.f32.mrf.mxu1 }
 0x34b   :  { %v507_v11 = vadd.f32 %v544_v6, %v506_v10 }
 0x34c   :  { %v668_v12 = vpop.f32.mrf.mxu1 }
 0x34d   :  { %511 = vst [vmem:[%s922_s9 + $0x8] sm:$0xff] %v507_v11 }

</bundles_post_ra>
